<compile_context>
chip_gen: v7x
topology: tpu7x:2x2x1
jax: 0.10.0
libtpu: 0.0.40
codegen_flags: <defaults>
</compile_context>

<pallas_src>
import jax
import jax.numpy as jnp
from jax import lax
from jax.experimental import pallas as pl
from jax.experimental.pallas import tpu as pltpu

# ----------------------------- "args" (hyperparameters) -----------------------------
T = 10                      # args.T   (number of stepper iterations in forward)
DT = 0.1                    # args.dt
GA, GB, GD = 0.8, 1.0, 1.0  # args.ga, args.gb, args.gd
GLK, GSOM = 0.1, 0.8        # args.glk, args.gsom
NOISE = 0.0                 # args.noise  -> deterministic kernel
# TODO(synk): the noise*torch.randn_like(...) term is omitted (NOISE=0); a stochastic
#             version would use pltpu.prng_seed + pltpu.stateful_normal inside the loop.
INITW = 0.5                 # args.initw
SIZE_TAB = [16, 32, 16]     # args.size_tab  -> ns = 2 (one hidden + one output layer)
BATCH = 8                   # args.batch_size
NS = len(SIZE_TAB) - 1      # = 2
N1, N2 = SIZE_TAB[1], SIZE_TAB[2]
NP = N1 + 2 * N2            # real packed state width = n1 + 2*n2 = 64
NPP = 128                   # lane-padded packed width (full 128-lane vreg)


def rho_ref(x):
    # TODO(synk): `rho` is referenced but not defined in the provided module snippet;
    #             using the logistic sigmoid (the standard choice for this model).
    return jax.nn.sigmoid(x)


# --------------------------------- Pallas kernel ------------------------------------
def dentritic_kernel(data_ref, wdata_ref, cbias_ref, wbig_ref, diag_ref,
                     gmask_ref, state0_ref, out_ref):
    # EUP-friendly sigmoid: exp and reciprocal both go to the EUP slot.
    def rho_k(x):
        return pl.reciprocal(1.0 + jnp.exp(-x), approx=False)

    # Loop-invariant constant drive, computed ONCE:
    #   dt*gb*(rho(data) @ Wpf0^T)  placed in the s0 lanes  +  pre-placed biases.
    c = (jnp.dot(rho_k(data_ref[...]), wdata_ref[...],
                 preferred_element_type=jnp.float32)
         + cbias_ref[...])                                  # [B, NPP]

    wbig = wbig_ref[...]                                    # [NPP, NPP] acts on rho(state)

    # Hoist broadcasts above the loop (JAX does not CSE broadcast_in_dim).
    diag_b = jnp.broadcast_to(diag_ref[...], c.shape)       # folded Euler/leak coeffs
    gmask_b = jnp.broadcast_to(gmask_ref[...], c.shape)     # dt*gsom on the i1 lanes

    def body(_, st):
        # One Euler step:
        #   state' = rho(state) @ W_big            (MXU: apical/basal/dendritic drive)
        #          + state * diag                  (VPU: folded leak coefficients)
        #          + roll(state, n2) * gsom_mask   (XLU+VPU: dt*gsom*s1 -> i1 lanes)
        #          + C                             (loop-invariant basal drive + biases)
        drive = jnp.dot(rho_k(st), wbig, preferred_element_type=jnp.float32)
        cross = pltpu.roll(st, shift=N2, axis=1) * gmask_b
        return drive + st * diag_b + cross + c

    # T is static -> fully unrolled flat instruction window for the LLO scheduler.
    out_ref[...] = lax.fori_loop(0, T, body, state0_ref[...], unroll=True)


# ------------------------------ host-side weight packing ----------------------------
def pack_params(Wpf0, bpf0, Wpf1, bpf1, Wpb0, Wip0, Wpi0):
    """Assemble fused kernel operands from PyTorch-layout ([out, in]) weights."""
    n0, n1, n2 = SIZE_TAB
    f32 = jnp.float32

    a_s0 = 1.0 - DT * (GLK + GB + GA)     # folded Euler coefficient for s0
    a_s1 = 1.0 - DT * (GLK + GB)          # for s1
    a_i1 = 1.0 - DT * (GLK + GD + GSOM)   # for i1

    # Loop-invariant drive: columns 0..n1-1 carry dt*gb*Wpf0^T, rest (incl. padding) zero.
    W_data = jnp.zeros((n0, NPP), f32).at[:, :n1].set(DT * GB * Wpf0.T)
    C_bias = (jnp.zeros((1, NPP), f32)
              .at[0, :n1].set(DT * GB * bpf0)
              .at[0, n1:n1 + n2].set(DT * GB * bpf1))

    # Drive matrix acting on rho(state) = [rho(s0) | rho(s1) | rho(i1) | rho(pad)].
    # Padding rows/cols are zero so rho(0)=0.5 on padding lanes contributes nothing.
    W_big = jnp.zeros((NPP, NPP), f32)
    W_big = W_big.at[n1:n1 + n2, 0:n1].set(DT * GA * Wpb0.T)      # rho(s1) -> s0 (apical)
    W_big = W_big.at[n1 + n2:NP, 0:n1].set(DT * GA * Wpi0.T)      # rho(i1) -> s0 (apical)
    W_big = W_big.at[0:n1, n1:n1 + n2].set(DT * GB * Wpf1.T)      # rho(s0) -> s1 (basal)
    W_big = W_big.at[0:n1, n1 + n2:NP].set(DT * GD * Wip0.T)      # rho(s0) -> i1 (dendrite)

    # Folded leak coefficients as a [1, NPP] vector (padding lanes get 0 -> stay 0).
    diag = (jnp.zeros((1, NPP), f32)
            .at[0, :n1].set(a_s0)
            .at[0, n1:n1 + n2].set(a_s1)
            .at[0, n1 + n2:NP].set(a_i1))

    # gsom cross-term mask: after roll(state, +n2) the s1 lanes sit under the i1 lanes.
    gmask = jnp.zeros((1, NPP), f32).at[0, n1 + n2:NP].set(DT * GSOM)

    return W_data, C_bias, W_big, diag, gmask


# ------------------------------------ wrapper ---------------------------------------
@jax.jit
def dentritic_forward(data, W_data, C_bias, W_big, diag, gmask, state0):
    n0 = data.shape[1]
    B = state0.shape[0]
    vmem = lambda: pl.BlockSpec(memory_space=pltpu.MemorySpace.VMEM)

    flops = 2 * B * n0 * NPP + T * 2 * B * NPP * NPP
    transcendentals = 2 * (B * n0 + T * B * NPP)      # exp + reciprocal per rho
    bytes_accessed = (data.size + W_data.size + C_bias.size + W_big.size
                      + diag.size + gmask.size + state0.size + B * NPP) * 4

    # Returns the packed [B, NPP] state; consumers slice it (keeps the jitted
    # graph to a single custom call — dispatch cost rivals the compute here).
    return pl.pallas_call(
        dentritic_kernel,
        out_shape=jax.ShapeDtypeStruct((B, NPP), jnp.float32),
        in_specs=[vmem() for _ in range(7)],
        out_specs=vmem(),
        input_output_aliases={6: 0},   # state0 buffer is reused for the output
        cost_estimate=pl.CostEstimate(flops=flops,
                                      transcendentals=transcendentals,
                                      bytes_accessed=bytes_accessed),
    )(data, W_data, C_bias, W_big, diag, gmask, state0)


# ------------------------------- pure-JAX reference ---------------------------------
def ref_forward(data, Wpf0, bpf0, Wpf1, bpf1, Wpb0, Wip0, Wpi0, s0, s1, i1):
    # Direct transcription of stepper() with PyTorch-layout weights [out, in].
    # forward() implements the beta == 0 (free phase) branch: T stepper calls.
    rdata = rho_ref(data)
    for _ in range(T):
        vb0 = rdata @ Wpf0.T + bpf0
        va0 = rho_ref(i1) @ Wpi0.T + rho_ref(s1) @ Wpb0.T
        dsdt0 = -GLK * s0 + GB * (vb0 - s0) + GA * (va0 - s0)
        vb1 = rho_ref(s0) @ Wpf1.T + bpf1
        dsdt1 = -GLK * s1 + GB * (vb1 - s1)
        vi1 = rho_ref(s0) @ Wip0.T
        didt1 = -GLK * i1 + GD * (vi1 - i1) + GSOM * (s1 - i1)
        s0 = s0 + DT * dsdt0
        s1 = s1 + DT * dsdt1
        i1 = i1 + DT * didt1
    return s0, s1, i1


# --------------------------------------- main ---------------------------------------
if __name__ == "__main__":
    n0, n1, n2 = SIZE_TAB
    key = jax.random.PRNGKey(0)
    k_data, k0, kb0, k1, kb1, kpb, kip, kpi = jax.random.split(key, 8)

    # PyTorch Linear layout: weight [out, in], bias [out]; uniform(-initw, initw).
    Wpf0 = jax.random.uniform(k0, (n1, n0), jnp.float32, -INITW, INITW)
    bpf0 = jax.random.uniform(kb0, (n1,), jnp.float32, -INITW, INITW)
    Wpf1 = jax.random.uniform(k1, (n2, n1), jnp.float32, -INITW, INITW)
    bpf1 = jax.random.uniform(kb1, (n2,), jnp.float32, -INITW, INITW)
    Wpb0 = jax.random.uniform(kpb, (n1, n2), jnp.float32, -INITW, INITW)
    Wip0 = jax.random.uniform(kip, (n2, n1), jnp.float32, -INITW, INITW)
    Wpi0 = jax.random.uniform(kpi, (n1, n2), jnp.float32, -INITW, INITW)

    # args.init_selfpred = True branch
    Wip0 = (GB + GLK) / (GB + GLK + GA) * Wpf1
    Wpb0 = -Wpi0

    # Inputs and initial hidden state (initHidden -> zeros, i[0] is None).
    data = jax.random.normal(k_data, (BATCH, n0), jnp.float32)
    s0 = jnp.zeros((BATCH, n1), jnp.float32)
    s1 = jnp.zeros((BATCH, n2), jnp.float32)
    i1 = jnp.zeros((BATCH, n2), jnp.float32)

    # Host-side fused parameter assembly + lane-padded packed state [s0 | s1 | i1 | 0].
    W_data, C_bias, W_big, diag, gmask = pack_params(Wpf0, bpf0, Wpf1, bpf1,
                                                     Wpb0, Wip0, Wpi0)
    state0 = (jnp.zeros((BATCH, NPP), jnp.float32)
              .at[:, :NP].set(jnp.concatenate([s0, s1, i1], axis=1)))

    packed = jax.block_until_ready(
        dentritic_forward(data, W_data, C_bias, W_big, diag, gmask, state0))

    # Split the packed lane-dense state at the consumer (outside the jitted graph).
    s0_k = packed[:, :n1]
    s1_k = packed[:, n1:n1 + n2]
    i1_k = packed[:, n1 + n2:NP]

    # Correctness check against the pure-JAX reference of the PyTorch forward.
    s0_r, s1_r, i1_r = ref_forward(data, Wpf0, bpf0, Wpf1, bpf1,
                                   Wpb0, Wip0, Wpi0, s0, s1, i1)
    assert jnp.allclose(s0_k, s0_r, atol=1e-4, rtol=1e-4)
    assert jnp.allclose(s1_k, s1_r, atol=1e-4, rtol=1e-4)
    assert jnp.allclose(i1_k, i1_r, atol=1e-4, rtol=1e-4)

    print("KERNEL_OK")
</pallas_src>

<mosaic_0001>
module attributes {stable_mosaic.version = 11 : i64} {
  func.func @dentritic_kernel(%arg0: memref<8x16xf32, #tpu.memory_space<vmem>>, %arg1: memref<16x128xf32, #tpu.memory_space<vmem>>, %arg2: memref<1x128xf32, #tpu.memory_space<vmem>>, %arg3: memref<128x128xf32, #tpu.memory_space<vmem>>, %arg4: memref<1x128xf32, #tpu.memory_space<vmem>>, %arg5: memref<1x128xf32, #tpu.memory_space<vmem>>, %arg6: memref<8x128xf32, #tpu.memory_space<vmem>>, %arg7: memref<8x128xf32, #tpu.memory_space<vmem>>) attributes {dimension_semantics = [], scalar_prefetch = 0 : i64, scratch_operands = 0 : i64, tpu.core_type = #tpu.core_type<tc>} {
    %c0 = arith.constant 0 : index
    %c0_0 = arith.constant 0 : index
    %0 = vector.load %arg0[%c0, %c0_0] : memref<8x16xf32, #tpu.memory_space<vmem>>, vector<8x16xf32>
    %cst = arith.constant 0.000000e+00 : f32
    %1 = vector.broadcast %cst : f32 to vector<8x16xf32>
    %2 = arith.subf %1, %0 : vector<8x16xf32>
    %3 = math.exp %2 : vector<8x16xf32>
    %cst_1 = arith.constant 1.000000e+00 : f32
    %4 = vector.broadcast %cst_1 : f32 to vector<8x16xf32>
    %5 = arith.addf %4, %3 : vector<8x16xf32>
    %6 = tpu.reciprocal %5 : vector<8x16xf32> -> vector<8x16xf32>
    %c0_2 = arith.constant 0 : index
    %c0_3 = arith.constant 0 : index
    %7 = vector.load %arg1[%c0_2, %c0_3] : memref<16x128xf32, #tpu.memory_space<vmem>>, vector<16x128xf32>
    %cst_4 = arith.constant dense<0.000000e+00> : vector<8x128xf32>
    %8 = tpu.matmul %6, %7, %cst_4 {dimension_numbers = #tpu.dot_dimension_numbers<[1], [0], [0], [1], [0, 0, 1, 1], [], []>} : vector<8x16xf32>, vector<16x128xf32>, vector<8x128xf32> -> vector<8x128xf32>
    %c0_5 = arith.constant 0 : index
    %c0_6 = arith.constant 0 : index
    %9 = vector.load %arg2[%c0_5, %c0_6] : memref<1x128xf32, #tpu.memory_space<vmem>>, vector<1x128xf32>
    %10 = vector.broadcast %9 : vector<1x128xf32> to vector<8x128xf32>
    %11 = arith.addf %8, %10 : vector<8x128xf32>
    %c0_7 = arith.constant 0 : index
    %c0_8 = arith.constant 0 : index
    %12 = vector.load %arg3[%c0_7, %c0_8] : memref<128x128xf32, #tpu.memory_space<vmem>>, vector<128x128xf32>
    %c0_9 = arith.constant 0 : index
    %c0_10 = arith.constant 0 : index
    %13 = vector.load %arg4[%c0_9, %c0_10] : memref<1x128xf32, #tpu.memory_space<vmem>>, vector<1x128xf32>
    %14 = vector.shape_cast %13 : vector<1x128xf32> to vector<1x128xf32>
    %15 = vector.broadcast %14 : vector<1x128xf32> to vector<8x128xf32>
    %c0_11 = arith.constant 0 : index
    %c0_12 = arith.constant 0 : index
    %16 = vector.load %arg5[%c0_11, %c0_12] : memref<1x128xf32, #tpu.memory_space<vmem>>, vector<1x128xf32>
    %17 = vector.shape_cast %16 : vector<1x128xf32> to vector<1x128xf32>
    %18 = vector.broadcast %17 : vector<1x128xf32> to vector<8x128xf32>
    %c0_13 = arith.constant 0 : index
    %c0_14 = arith.constant 0 : index
    %19 = vector.load %arg6[%c0_13, %c0_14] : memref<8x128xf32, #tpu.memory_space<vmem>>, vector<8x128xf32>
    %c0_i32 = arith.constant 0 : i32
    %cst_15 = arith.constant 0.000000e+00 : f32
    %20 = vector.broadcast %cst_15 : f32 to vector<8x128xf32>
    %21 = arith.subf %20, %19 : vector<8x128xf32>
    %22 = math.exp %21 : vector<8x128xf32>
    %cst_16 = arith.constant 1.000000e+00 : f32
    %23 = vector.broadcast %cst_16 : f32 to vector<8x128xf32>
    %24 = arith.addf %23, %22 : vector<8x128xf32>
    %25 = tpu.reciprocal %24 : vector<8x128xf32> -> vector<8x128xf32>
    %cst_17 = arith.constant dense<0.000000e+00> : vector<8x128xf32>
    %26 = tpu.matmul %25, %12, %cst_17 {dimension_numbers = #tpu.dot_dimension_numbers<[1], [0], [0], [1], [0, 0, 1, 1], [], []>} : vector<8x128xf32>, vector<128x128xf32>, vector<8x128xf32> -> vector<8x128xf32>
    %c16_i32 = arith.constant 16 : i32
    %27 = tpu.dynamic_rotate %19 by %c16_i32 dim 1 : vector<8x128xf32>, i32 -> vector<8x128xf32>
    %28 = arith.mulf %27, %18 : vector<8x128xf32>
    %29 = arith.mulf %19, %15 : vector<8x128xf32>
    %30 = arith.addf %26, %29 : vector<8x128xf32>
    %31 = arith.addf %30, %28 : vector<8x128xf32>
    %32 = arith.addf %31, %11 : vector<8x128xf32>
    %c1_i32 = arith.constant 1 : i32
    %cst_18 = arith.constant 0.000000e+00 : f32
    %33 = vector.broadcast %cst_18 : f32 to vector<8x128xf32>
    %34 = arith.subf %33, %32 : vector<8x128xf32>
    %35 = math.exp %34 : vector<8x128xf32>
    %cst_19 = arith.constant 1.000000e+00 : f32
    %36 = vector.broadcast %cst_19 : f32 to vector<8x128xf32>
    %37 = arith.addf %36, %35 : vector<8x128xf32>
    %38 = tpu.reciprocal %37 : vector<8x128xf32> -> vector<8x128xf32>
    %cst_20 = arith.constant dense<0.000000e+00> : vector<8x128xf32>
    %39 = tpu.matmul %38, %12, %cst_20 {dimension_numbers = #tpu.dot_dimension_numbers<[1], [0], [0], [1], [0, 0, 1, 1], [], []>} : vector<8x128xf32>, vector<128x128xf32>, vector<8x128xf32> -> vector<8x128xf32>
    %c16_i32_21 = arith.constant 16 : i32
    %40 = tpu.dynamic_rotate %32 by %c16_i32_21 dim 1 : vector<8x128xf32>, i32 -> vector<8x128xf32>
    %41 = arith.mulf %40, %18 : vector<8x128xf32>
    %42 = arith.mulf %32, %15 : vector<8x128xf32>
    %43 = arith.addf %39, %42 : vector<8x128xf32>
    %44 = arith.addf %43, %41 : vector<8x128xf32>
    %45 = arith.addf %44, %11 : vector<8x128xf32>
    %c2_i32 = arith.constant 2 : i32
    %cst_22 = arith.constant 0.000000e+00 : f32
    %46 = vector.broadcast %cst_22 : f32 to vector<8x128xf32>
    %47 = arith.subf %46, %45 : vector<8x128xf32>
    %48 = math.exp %47 : vector<8x128xf32>
    %cst_23 = arith.constant 1.000000e+00 : f32
    %49 = vector.broadcast %cst_23 : f32 to vector<8x128xf32>
    %50 = arith.addf %49, %48 : vector<8x128xf32>
    %51 = tpu.reciprocal %50 : vector<8x128xf32> -> vector<8x128xf32>
    %cst_24 = arith.constant dense<0.000000e+00> : vector<8x128xf32>
    %52 = tpu.matmul %51, %12, %cst_24 {dimension_numbers = #tpu.dot_dimension_numbers<[1], [0], [0], [1], [0, 0, 1, 1], [], []>} : vector<8x128xf32>, vector<128x128xf32>, vector<8x128xf32> -> vector<8x128xf32>
    %c16_i32_25 = arith.constant 16 : i32
    %53 = tpu.dynamic_rotate %45 by %c16_i32_25 dim 1 : vector<8x128xf32>, i32 -> vector<8x128xf32>
    %54 = arith.mulf %53, %18 : vector<8x128xf32>
    %55 = arith.mulf %45, %15 : vector<8x128xf32>
    %56 = arith.addf %52, %55 : vector<8x128xf32>
    %57 = arith.addf %56, %54 : vector<8x128xf32>
    %58 = arith.addf %57, %11 : vector<8x128xf32>
    %c3_i32 = arith.constant 3 : i32
    %cst_26 = arith.constant 0.000000e+00 : f32
    %59 = vector.broadcast %cst_26 : f32 to vector<8x128xf32>
    %60 = arith.subf %59, %58 : vector<8x128xf32>
    %61 = math.exp %60 : vector<8x128xf32>
    %cst_27 = arith.constant 1.000000e+00 : f32
    %62 = vector.broadcast %cst_27 : f32 to vector<8x128xf32>
    %63 = arith.addf %62, %61 : vector<8x128xf32>
    %64 = tpu.reciprocal %63 : vector<8x128xf32> -> vector<8x128xf32>
    %cst_28 = arith.constant dense<0.000000e+00> : vector<8x128xf32>
    %65 = tpu.matmul %64, %12, %cst_28 {dimension_numbers = #tpu.dot_dimension_numbers<[1], [0], [0], [1], [0, 0, 1, 1], [], []>} : vector<8x128xf32>, vector<128x128xf32>, vector<8x128xf32> -> vector<8x128xf32>
    %c16_i32_29 = arith.constant 16 : i32
    %66 = tpu.dynamic_rotate %58 by %c16_i32_29 dim 1 : vector<8x128xf32>, i32 -> vector<8x128xf32>
    %67 = arith.mulf %66, %18 : vector<8x128xf32>
    %68 = arith.mulf %58, %15 : vector<8x128xf32>
    %69 = arith.addf %65, %68 : vector<8x128xf32>
    %70 = arith.addf %69, %67 : vector<8x128xf32>
    %71 = arith.addf %70, %11 : vector<8x128xf32>
    %c4_i32 = arith.constant 4 : i32
    %cst_30 = arith.constant 0.000000e+00 : f32
    %72 = vector.broadcast %cst_30 : f32 to vector<8x128xf32>
    %73 = arith.subf %72, %71 : vector<8x128xf32>
    %74 = math.exp %73 : vector<8x128xf32>
    %cst_31 = arith.constant 1.000000e+00 : f32
    %75 = vector.broadcast %cst_31 : f32 to vector<8x128xf32>
    %76 = arith.addf %75, %74 : vector<8x128xf32>
    %77 = tpu.reciprocal %76 : vector<8x128xf32> -> vector<8x128xf32>
    %cst_32 = arith.constant dense<0.000000e+00> : vector<8x128xf32>
    %78 = tpu.matmul %77, %12, %cst_32 {dimension_numbers = #tpu.dot_dimension_numbers<[1], [0], [0], [1], [0, 0, 1, 1], [], []>} : vector<8x128xf32>, vector<128x128xf32>, vector<8x128xf32> -> vector<8x128xf32>
    %c16_i32_33 = arith.constant 16 : i32
    %79 = tpu.dynamic_rotate %71 by %c16_i32_33 dim 1 : vector<8x128xf32>, i32 -> vector<8x128xf32>
    %80 = arith.mulf %79, %18 : vector<8x128xf32>
    %81 = arith.mulf %71, %15 : vector<8x128xf32>
    %82 = arith.addf %78, %81 : vector<8x128xf32>
    %83 = arith.addf %82, %80 : vector<8x128xf32>
    %84 = arith.addf %83, %11 : vector<8x128xf32>
    %c5_i32 = arith.constant 5 : i32
    %cst_34 = arith.constant 0.000000e+00 : f32
    %85 = vector.broadcast %cst_34 : f32 to vector<8x128xf32>
    %86 = arith.subf %85, %84 : vector<8x128xf32>
    %87 = math.exp %86 : vector<8x128xf32>
    %cst_35 = arith.constant 1.000000e+00 : f32
    %88 = vector.broadcast %cst_35 : f32 to vector<8x128xf32>
    %89 = arith.addf %88, %87 : vector<8x128xf32>
    %90 = tpu.reciprocal %89 : vector<8x128xf32> -> vector<8x128xf32>
    %cst_36 = arith.constant dense<0.000000e+00> : vector<8x128xf32>
    %91 = tpu.matmul %90, %12, %cst_36 {dimension_numbers = #tpu.dot_dimension_numbers<[1], [0], [0], [1], [0, 0, 1, 1], [], []>} : vector<8x128xf32>, vector<128x128xf32>, vector<8x128xf32> -> vector<8x128xf32>
    %c16_i32_37 = arith.constant 16 : i32
    %92 = tpu.dynamic_rotate %84 by %c16_i32_37 dim 1 : vector<8x128xf32>, i32 -> vector<8x128xf32>
    %93 = arith.mulf %92, %18 : vector<8x128xf32>
    %94 = arith.mulf %84, %15 : vector<8x128xf32>
    %95 = arith.addf %91, %94 : vector<8x128xf32>
    %96 = arith.addf %95, %93 : vector<8x128xf32>
    %97 = arith.addf %96, %11 : vector<8x128xf32>
    %c6_i32 = arith.constant 6 : i32
    %cst_38 = arith.constant 0.000000e+00 : f32
    %98 = vector.broadcast %cst_38 : f32 to vector<8x128xf32>
    %99 = arith.subf %98, %97 : vector<8x128xf32>
    %100 = math.exp %99 : vector<8x128xf32>
    %cst_39 = arith.constant 1.000000e+00 : f32
    %101 = vector.broadcast %cst_39 : f32 to vector<8x128xf32>
    %102 = arith.addf %101, %100 : vector<8x128xf32>
    %103 = tpu.reciprocal %102 : vector<8x128xf32> -> vector<8x128xf32>
    %cst_40 = arith.constant dense<0.000000e+00> : vector<8x128xf32>
    %104 = tpu.matmul %103, %12, %cst_40 {dimension_numbers = #tpu.dot_dimension_numbers<[1], [0], [0], [1], [0, 0, 1, 1], [], []>} : vector<8x128xf32>, vector<128x128xf32>, vector<8x128xf32> -> vector<8x128xf32>
    %c16_i32_41 = arith.constant 16 : i32
    %105 = tpu.dynamic_rotate %97 by %c16_i32_41 dim 1 : vector<8x128xf32>, i32 -> vector<8x128xf32>
    %106 = arith.mulf %105, %18 : vector<8x128xf32>
    %107 = arith.mulf %97, %15 : vector<8x128xf32>
    %108 = arith.addf %104, %107 : vector<8x128xf32>
    %109 = arith.addf %108, %106 : vector<8x128xf32>
    %110 = arith.addf %109, %11 : vector<8x128xf32>
    %c7_i32 = arith.constant 7 : i32
    %cst_42 = arith.constant 0.000000e+00 : f32
    %111 = vector.broadcast %cst_42 : f32 to vector<8x128xf32>
    %112 = arith.subf %111, %110 : vector<8x128xf32>
    %113 = math.exp %112 : vector<8x128xf32>
    %cst_43 = arith.constant 1.000000e+00 : f32
    %114 = vector.broadcast %cst_43 : f32 to vector<8x128xf32>
    %115 = arith.addf %114, %113 : vector<8x128xf32>
    %116 = tpu.reciprocal %115 : vector<8x128xf32> -> vector<8x128xf32>
    %cst_44 = arith.constant dense<0.000000e+00> : vector<8x128xf32>
    %117 = tpu.matmul %116, %12, %cst_44 {dimension_numbers = #tpu.dot_dimension_numbers<[1], [0], [0], [1], [0, 0, 1, 1], [], []>} : vector<8x128xf32>, vector<128x128xf32>, vector<8x128xf32> -> vector<8x128xf32>
    %c16_i32_45 = arith.constant 16 : i32
    %118 = tpu.dynamic_rotate %110 by %c16_i32_45 dim 1 : vector<8x128xf32>, i32 -> vector<8x128xf32>
    %119 = arith.mulf %118, %18 : vector<8x128xf32>
    %120 = arith.mulf %110, %15 : vector<8x128xf32>
    %121 = arith.addf %117, %120 : vector<8x128xf32>
    %122 = arith.addf %121, %119 : vector<8x128xf32>
    %123 = arith.addf %122, %11 : vector<8x128xf32>
    %c8_i32 = arith.constant 8 : i32
    %cst_46 = arith.constant 0.000000e+00 : f32
    %124 = vector.broadcast %cst_46 : f32 to vector<8x128xf32>
    %125 = arith.subf %124, %123 : vector<8x128xf32>
    %126 = math.exp %125 : vector<8x128xf32>
    %cst_47 = arith.constant 1.000000e+00 : f32
    %127 = vector.broadcast %cst_47 : f32 to vector<8x128xf32>
    %128 = arith.addf %127, %126 : vector<8x128xf32>
    %129 = tpu.reciprocal %128 : vector<8x128xf32> -> vector<8x128xf32>
    %cst_48 = arith.constant dense<0.000000e+00> : vector<8x128xf32>
    %130 = tpu.matmul %129, %12, %cst_48 {dimension_numbers = #tpu.dot_dimension_numbers<[1], [0], [0], [1], [0, 0, 1, 1], [], []>} : vector<8x128xf32>, vector<128x128xf32>, vector<8x128xf32> -> vector<8x128xf32>
    %c16_i32_49 = arith.constant 16 : i32
    %131 = tpu.dynamic_rotate %123 by %c16_i32_49 dim 1 : vector<8x128xf32>, i32 -> vector<8x128xf32>
    %132 = arith.mulf %131, %18 : vector<8x128xf32>
    %133 = arith.mulf %123, %15 : vector<8x128xf32>
    %134 = arith.addf %130, %133 : vector<8x128xf32>
    %135 = arith.addf %134, %132 : vector<8x128xf32>
    %136 = arith.addf %135, %11 : vector<8x128xf32>
    %c9_i32 = arith.constant 9 : i32
    %cst_50 = arith.constant 0.000000e+00 : f32
    %137 = vector.broadcast %cst_50 : f32 to vector<8x128xf32>
    %138 = arith.subf %137, %136 : vector<8x128xf32>
    %139 = math.exp %138 : vector<8x128xf32>
    %cst_51 = arith.constant 1.000000e+00 : f32
    %140 = vector.broadcast %cst_51 : f32 to vector<8x128xf32>
    %141 = arith.addf %140, %139 : vector<8x128xf32>
    %142 = tpu.reciprocal %141 : vector<8x128xf32> -> vector<8x128xf32>
    %cst_52 = arith.constant dense<0.000000e+00> : vector<8x128xf32>
    %143 = tpu.matmul %142, %12, %cst_52 {dimension_numbers = #tpu.dot_dimension_numbers<[1], [0], [0], [1], [0, 0, 1, 1], [], []>} : vector<8x128xf32>, vector<128x128xf32>, vector<8x128xf32> -> vector<8x128xf32>
    %c16_i32_53 = arith.constant 16 : i32
    %144 = tpu.dynamic_rotate %136 by %c16_i32_53 dim 1 : vector<8x128xf32>, i32 -> vector<8x128xf32>
    %145 = arith.mulf %144, %18 : vector<8x128xf32>
    %146 = arith.mulf %136, %15 : vector<8x128xf32>
    %147 = arith.addf %143, %146 : vector<8x128xf32>
    %148 = arith.addf %147, %145 : vector<8x128xf32>
    %149 = arith.addf %148, %11 : vector<8x128xf32>
    %c0_54 = arith.constant 0 : index
    %c0_55 = arith.constant 0 : index
    %150 = vector.load %arg7[%c0_54, %c0_55] : memref<8x128xf32, #tpu.memory_space<vmem>>, vector<8x128xf32>
    tpu.vector_store %arg7[%c0_54, %c0_55], %149 {strides = array<i32>} : memref<8x128xf32, #tpu.memory_space<vmem>>, vector<8x128xf32>,
    return
  }
}

</mosaic_0001>

<bundles_post_ra>
// kernel: dentritic_forward.1
= control target key start
LH: loop header
LB: loop body
LE: loop exit
PB: predicated region body
PF: predicated region fallthrough
CT: control target
= control target key end

     0   :  { %12 = vsyncpa [#allocation3], 0  ;;  %s2255_s0 = inlined_call_operand.vmem [shape: f32[8,16], index: 0, kind: input, shape index: {}]   ;;  %s2256_s1 = inlined_call_operand.vmem [shape: f32[16,128], index: 1, kind: input, shape index: {}]   ;;  %s2257_s2 = inlined_call_operand.vmem [shape: f32[1,128], index: 2, kind: input, shape index: {}]   ;;  %s2258_s3 = inlined_call_operand.hbm [shape: f32[128,128], index: 3, kind: input, shape index: {}]   ;;  %s2259_s4 = inlined_call_operand.vmem [shape: f32[1,128], index: 4, kind: input, shape index: {}]   ;;  %s2260_s5 = inlined_call_operand.vmem [shape: f32[1,128], index: 5, kind: input, shape index: {}]   ;;  %s2261_s6 = inlined_call_operand.hbm [shape: f32[8,128], index: 6, kind: input, shape index: {}, may-alias: {6,7}]   ;;  %s2262_s7 = inlined_call_operand.hbm [shape: f32[8,128], index: 7, kind: output, shape index: {}, may-alias: {6,7}]  }
   0x1   :  { %13 = vsyncpa [#allocation6], 0 }
   0x2   :  { %14 = vsyncpa [#allocation4], 0  ;;  %s1902_s24 = smov [#allocation2]   ;;  %s1830_s28 = scalar_lea.hbm %s2258_s3, 2048 }
   0x3   :  { %s26_s25 = sshll.u32 %s1902_s24, 4  ;;  %p1831_p0 = scmp.ne.s32.totalorder %s2258_s3, %s1830_s28  ;;  %s27_s25 = int_to_ptr.vmem [resolvable:$true] %s26_s25 }
   0x4   :  { %p1834_p1 = scmp.lt.u32.totalorder %s1830_s28, %s2258_s3 }
   0x6   :  { %p1836_p2 = pnand %p1834_p1, %p1831_p0 }
   0x8   :  { %1839 = shalt.err (!%p1836_p2)
}
   0x9   :  { %s1840_s10 = scalar_lea.vmem %s27_s25, 2048  ;;  %p1845_p4 = scmp.lt.s32.totalorder %s27_s25, %s27_s25 }
   0xa   :  { %p1841_p3 = scmp.ne.s32.totalorder %s27_s25, %s1840_s10  ;;  %p1846_p5 = scmp.lt.s32.totalorder %s1840_s10, %s1840_s10 }
   0xc   :  { %p1847_p6 = por %p1846_p5, %p1845_p4 }
   0xe   :  { %p1848_p7 = pnand %p1847_p6, %p1841_p3 }
  0x10   :  { %1851 = shalt.err (!%p1848_p7)
}
  0x11   :  { %s1903_s11 = smov 128   ;;  %s1904_s12 = smov 8  }
  0x12   :  { %32 = dma.hbm_to_vmem [thread:$0]  %s2258_s3, 2048, %s27_s25, [#allocation3], %s1903_s11, %s1903_s11, %s1904_s12  }
  0x13   :  { %s1905_s15 = smov [#allocation5]   ;;  %s1852_s19 = scalar_lea.hbm %s2261_s6, 128 }
  0x14   :  { %s43_s16 = sshll.u32 %s1905_s15, 4  ;;  %p1853_p8 = scmp.ne.s32.totalorder %s2261_s6, %s1852_s19  ;;  %s44_s16 = int_to_ptr.vmem [resolvable:$true] %s43_s16 }
  0x15   :  { %p1856_p9 = scmp.lt.u32.totalorder %s1852_s19, %s2261_s6 }
  0x17   :  { %p1858_p10 = pnand %p1856_p9, %p1853_p8 }
  0x19   :  { %1861 = shalt.err (!%p1858_p10)
}
  0x1a   :  { %s1862_s24 = scalar_lea.vmem %s44_s16, 128  ;;  %p1867_p12 = scmp.lt.s32.totalorder %s44_s16, %s44_s16 }
  0x1b   :  { %p1863_p11 = scmp.ne.s32.totalorder %s44_s16, %s1862_s24  ;;  %p1868_p13 = scmp.lt.s32.totalorder %s1862_s24, %s1862_s24 }
  0x1d   :  { %p1869_p0 = por %p1868_p13, %p1867_p12 }
  0x1f   :  { %p1870_p1 = pnand %p1869_p0, %p1863_p11 }
  0x21   :  { %1873 = shalt.err (!%p1870_p1)
}
  0x22   :  { %46 = dma.hbm_to_vmem [thread:$0]  %s2261_s6, 128, %s44_s16, [#allocation6]  }
  0x23   :  { %1896 = dma.done.wait [#allocation3], 2048  }
  0x24   :  { %1897 = vsyncadd [#allocation3], 4294965248 }
  0x25   :  { %1898 = dma.done.wait [#allocation6], 128  }
  0x26   :  { %1899 = vsyncadd [#allocation6], 4294967168  ;;  %v1906_v0 = vmov 0.0|0.0   ;;  %vm1907_vm0 = vmmov 0   ;;  %v1908_v1 = vmov 0.0   ;;  %v142_v2 = vld [vmem:[#allocation2] sm:$0xff] }
  0x27   :  { %1537 = vmatprep.subr.bf16.mxu1 %v1906_v0  ;;  %1534 = vmatprep.subr.bf16.mxu0 %v1906_v0  ;;  %v143_v3 = vld [vmem:[#allocation2 + $0x8] sm:$0xff]  ;;  %v144_v4 = vld [vmem:[#allocation2 + $0x10] sm:$0xff]  ;;  %v145_v6 = vld [vmem:[#allocation2 + $0x18] sm:$0xff]  ;;  %s1909_s8 = smov 16   ;;  %vm68_vm1 = vcmask 130048  }
  0x28   :  { %1216 = vmatprep.mubr.msk.f32.mxu1 %vm1907_vm0, %v1908_v1  ;;  %1181 = vmatprep.mubr.msk.f32.mxu0 %vm1907_vm0, %v1908_v1  ;;  %v1981_v5 = vpack.c.bf16 %v143_v3, %v142_v2  ;;  %v1984_v7 = vpack.c.bf16 %v145_v6, %v144_v4  ;;  %v146_v8 = vld [vmem:[#allocation2 + $0x20] sm:$0xff]  ;;  %v147_v9 = vld [vmem:[#allocation2 + $0x28] sm:$0xff]  ;;  %v59_v10 = vld [vmem:[%s2256_s1] sm:$0xff] }
  0x29   :  { %v60_v11 = vld [vmem:[%s2256_s1 + $0x8] sm:$0xff]  ;;  %v1993_v13 = vld [vmem:[#allocation5] sm:$0xff]  ;;  %v53_v14 = vld [vmem:[%s2255_s0] sm:$0xff]  ;;  %v1999_v15 = vpack.c.bf16 %v147_v9, %v146_v8 }
  0x2a   :  { %1539 = vmatpush3.bf16.msra.mxu1 %v1981_v5  ;;  %v1535_v12 = vpack.c.bf16 %v60_v11, %v59_v10  ;;  %v173_v16 = vsub.f32 0.0, %v1993_v13  ;;  %v54_v17 = vsub.f32 0.0, %v53_v14  ;;  %178 = vrot.lane.b32.xlu0 %v1993_v13, %s1909_s8  ;;  %v148_v18 = vld [vmem:[#allocation2 + $0x30] sm:$0xff]  ;;  %v149_v19 = vld [vmem:[#allocation2 + $0x38] sm:$0xff]  ;;  %v150_v23 = vld [vmem:[#allocation2 + $0x40] sm:$0xff] }
  0x2b   :  { %1540 = vmatprep.subr.bf16.mxu1 %v1906_v0  ;;  %v2007_v22 = vpack.c.bf16 %v149_v19, %v148_v18  ;;  %v151_v24 = vld [vmem:[#allocation2 + $0x48] sm:$0xff]  ;;  %v152_v26 = vld [vmem:[#allocation2 + $0x50] sm:$0xff]  ;;  %v153_v27 = vld [vmem:[#allocation2 + $0x58] sm:$0xff] }
  0x2c   :  { %1536 = vmatpush3.bf16.msra.mxu0 %v1535_v12  ;;  %v174_v20 = vmul.f32 1.442695, %v173_v16  ;;  %v55_v21 = vmul.f32 1.442695, %v54_v17  ;;  %v2011_v25 = vpack.c.bf16 %v151_v24, %v150_v23  ;;  %v2015_v28 = vpack.c.bf16 %v153_v27, %v152_v26  ;;  %v154_v29 = vld [vmem:[#allocation2 + $0x60] sm:$0xff]  ;;  %v155_v30 = vld [vmem:[#allocation2 + $0x68] sm:$0xff] }
  0x2d   :  { %1561 = vmatprep.subr.bf16.mxu0 %v1906_v0  ;;  %v2019_v34 = vpack.c.bf16 %v155_v30, %v154_v29  ;;  %v156_v36 = vld [vmem:[#allocation2 + $0x70] sm:$0xff]  ;;  %v157_v37 = vld [vmem:[#allocation2 + $0x78] sm:$0xff] }
  0x2e   :  { %1542 = vmatpush3.bf16.msra.mxu1 %v1984_v7  ;;  %1786 = vpow2.f32 %v174_v20  ;;  %v2023_v38 = vpack.c.bf16 %v157_v37, %v156_v36  ;;  %v2067_v41 = vld [vmem:[%s2259_s4] ss:$0 sm:$0xff] }
  0x2f   :  { %1543 = vmatprep.subr.bf16.mxu1 %v1906_v0  ;;  %1788 = vpow2.f32 %v55_v21  ;;  %v2072_v43 = vld [vmem:[%s2260_s5] ss:$0 sm:$0xff]  ;;  %v181_v44 = vmul.f32 %v2067_v41, %v1993_v13 }
  0x30   :  { %v1000_v46 = vld [vmem:[%s2257_s2] ss:$0 sm:$0xff]  ;;  %s1910_s2 = smov [#allocation7]  }
  0x31   :  { %s990_s4 = sshll.u32 %s1910_s2, 4  ;;  %s991_s4 = int_to_ptr.vmem [resolvable:$true] %s990_s4 }
  0x32   :  { %1545 = vmatpush3.bf16.msra.mxu1 %v1999_v15  ;;  %s1874_s5 = scalar_lea.vmem %s991_s4, 128  ;;  %p1879_p3 = scmp.lt.s32.totalorder %s991_s4, %s991_s4 }
  0x33   :  { %1546 = vmatprep.subr.bf16.mxu1 %v1906_v0  ;;  %p1875_p2 = scmp.ne.s32.totalorder %s991_s4, %s1874_s5  ;;  %p1880_p4 = scmp.lt.s32.totalorder %s1874_s5, %s1874_s5 }
  0x35   :  { %p1881_p5 = por %p1880_p4, %p1879_p3 }
  0x36   :  { %1548 = vmatpush3.bf16.msra.mxu1 %v2007_v22 }
  0x37   :  { %1549 = vmatprep.subr.bf16.mxu1 %v1906_v0  ;;  %p1882_p6 = pnand %p1881_p5, %p1875_p2 }
  0x38   :  { %v1787_v31 = vpop.eup %1786 }
  0x39   :  { %v1789_v32 = vpop.eup %1788  ;;  %v176_v33 = vadd.f32 1.0, %v1787_v31 }
  0x3a   :  { %1551 = vmatpush3.bf16.msra.mxu1 %v2011_v25  ;;  %v57_v35 = vadd.f32 1.0, %v1789_v32 }
  0x3b   :  { %1552 = vmatprep.subr.bf16.mxu1 %v1906_v0  ;;  %1790 = vrcp.f32 %v176_v33 }
  0x3c   :  { %1792 = vrcp.f32 %v57_v35 }
  0x3e   :  { %1554 = vmatpush3.bf16.msra.mxu1 %v2015_v28 }
  0x3f   :  { %1555 = vmatprep.subr.bf16.mxu1 %v1906_v0 }
  0x42   :  { %1557 = vmatpush3.bf16.msra.mxu1 %v2019_v34 }
  0x43   :  { %1558 = vmatprep.subr.bf16.mxu1 %v1906_v0 }
  0x45   :  { %v1791_v39 = vpop.eup %1790 }
  0x46   :  { %1560 = vmatpush3.bf16.msra.mxu1 %v2023_v38  ;;  %v1793_v40 = vpop.eup %1792 }
  0x47   :  { %1585 = vmatprep.subr.bf16.mxu1 %v1906_v0  ;;  %1182 = vmatmul.mubr.msk.f32.vlgmr.msra.gmra.mrb[0].mxu0 %vm68_vm1, %v1793_v40 }
  0x48   :  { %1563 = vmatpush3.bf16.msra.mxu0 %v1981_v5  ;;  %1251 = vmatprep.mubr.msk.f32.mxu0 %vm1907_vm0, %v1908_v1 }
  0x49   :  { %1217 = vmatmul.mubr.f32.vlgmr.msra.gmra.mrb[0].mxu1 %v1791_v39  ;;  %1564 = vmatprep.subr.bf16.mxu0 %v1906_v0 }
  0x4a   :  { %1587 = vmatpush3.bf16.msra.mxu1 %v1981_v5  ;;  %1286 = vmatprep.mubr.msk.f32.mxu1 %vm1907_vm0, %v1908_v1 }
  0x4b   :  { %1588 = vmatprep.subr.bf16.mxu1 %v1906_v0 }
  0x4c   :  { %1566 = vmatpush3.bf16.msra.mxu0 %v1984_v7 }
  0x4d   :  { %1567 = vmatprep.subr.bf16.mxu0 %v1906_v0 }
  0x4e   :  { %1590 = vmatpush3.bf16.msra.mxu1 %v1984_v7 }
  0x4f   :  { %1591 = vmatprep.subr.bf16.mxu1 %v1906_v0 }
  0x50   :  { %1569 = vmatpush3.bf16.msra.mxu0 %v1999_v15 }
  0x51   :  { %1570 = vmatprep.subr.bf16.mxu0 %v1906_v0 }
  0x52   :  { %1593 = vmatpush3.bf16.msra.mxu1 %v1999_v15 }
  0x53   :  { %1594 = vmatprep.subr.bf16.mxu1 %v1906_v0 }
  0x54   :  { %1572 = vmatpush3.bf16.msra.mxu0 %v2007_v22 }
  0x55   :  { %1573 = vmatprep.subr.bf16.mxu0 %v1906_v0 }
  0x56   :  { %1596 = vmatpush3.bf16.msra.mxu1 %v2007_v22 }
  0x57   :  { %1597 = vmatprep.subr.bf16.mxu1 %v1906_v0 }
  0x58   :  { %1575 = vmatpush3.bf16.msra.mxu0 %v2011_v25 }
  0x59   :  { %1576 = vmatprep.subr.bf16.mxu0 %v1906_v0 }
  0x5a   :  { %1599 = vmatpush3.bf16.msra.mxu1 %v2011_v25 }
  0x5b   :  { %1600 = vmatprep.subr.bf16.mxu1 %v1906_v0 }
  0x5c   :  { %1578 = vmatpush3.bf16.msra.mxu0 %v2015_v28 }
  0x5d   :  { %1579 = vmatprep.subr.bf16.mxu0 %v1906_v0 }
  0x5e   :  { %1602 = vmatpush3.bf16.msra.mxu1 %v2015_v28 }
  0x5f   :  { %1603 = vmatprep.subr.bf16.mxu1 %v1906_v0 }
  0x60   :  { %1581 = vmatpush3.bf16.msra.mxu0 %v2019_v34 }
  0x61   :  { %1582 = vmatprep.subr.bf16.mxu0 %v1906_v0 }
  0x62   :  { %1605 = vmatpush3.bf16.msra.mxu1 %v2019_v34 }
  0x63   :  { %1606 = vmatprep.subr.bf16.mxu1 %v1906_v0 }
  0x64   :  { %1584 = vmatpush3.bf16.msra.mxu0 %v2023_v38 }
  0x65   :  { %1609 = vmatprep.subr.bf16.mxu0 %v1906_v0 }
  0x66   :  { %1608 = vmatpush3.bf16.msra.mxu1 %v2023_v38 }
  0x67   :  { %1633 = vmatprep.subr.bf16.mxu1 %v1906_v0 }
  0x9c   :  { %v179_v42 = vpop.permute.xlu0 %178 }
  0x9d   :  { %v180_v45 = vmul.f32 %v2072_v43, %v179_v42 }
 0x11a   :  { %v138_v49 = vpop.f32.mrb[0].mxu0 }
 0x11b   :  { %v2080_v51 = vadd.f32 %v1000_v46, %v138_v49  ;;  %v1183_v52 = vpop.f32.mrb[1].mxu0 }
 0x11c   :  { %v248_v47 = vpop.f32.mrb[0].mxu1 }
 0x11d   :  { %v249_v48 = vadd.f32 %v248_v47, %v181_v44  ;;  %v1218_v50 = vpop.f32.mrb[1].mxu1 }
 0x11f   :  { %v252_v53 = vadd.f32 %v249_v48, %v180_v45 }
 0x121   :  { %v253_v54 = vadd.f32 %v252_v53, %v2080_v51 }
 0x123   :  { %259 = vrot.lane.b32.xlu0 %v253_v54, %s1909_s8  ;;  %v254_v55 = vsub.f32 0.0, %v253_v54  ;;  %v262_v61 = vmul.f32 %v2067_v41, %v253_v54 }
 0x125   :  { %v255_v56 = vmul.f32 1.442695, %v254_v55 }
 0x127   :  { %1794 = vpow2.f32 %v255_v56 }
 0x131   :  { %v1795_v57 = vpop.eup %1794 }
 0x132   :  { %v257_v58 = vadd.f32 1.0, %v1795_v57 }
 0x134   :  { %1796 = vrcp.f32 %v257_v58 }
 0x13e   :  { %v1797_v59 = vpop.eup %1796 }
 0x13f   :  { %1252 = vmatmul.mubr.f32.vlgmr.msra.gmra.mrb[2].mxu0 %v1797_v59 }
 0x140   :  { %1611 = vmatpush3.bf16.msra.mxu0 %v1981_v5  ;;  %1321 = vmatprep.mubr.msk.f32.mxu0 %vm1907_vm0, %v1908_v1 }
 0x141   :  { %1612 = vmatprep.subr.bf16.mxu0 %v1906_v0 }
 0x144   :  { %1614 = vmatpush3.bf16.msra.mxu0 %v1984_v7 }
 0x145   :  { %1615 = vmatprep.subr.bf16.mxu0 %v1906_v0 }
 0x148   :  { %1617 = vmatpush3.bf16.msra.mxu0 %v1999_v15 }
 0x149   :  { %1618 = vmatprep.subr.bf16.mxu0 %v1906_v0 }
 0x14c   :  { %1620 = vmatpush3.bf16.msra.mxu0 %v2007_v22 }
 0x14d   :  { %1621 = vmatprep.subr.bf16.mxu0 %v1906_v0 }
 0x150   :  { %1623 = vmatpush3.bf16.msra.mxu0 %v2011_v25 }
 0x151   :  { %1624 = vmatprep.subr.bf16.mxu0 %v1906_v0 }
 0x154   :  { %1626 = vmatpush3.bf16.msra.mxu0 %v2015_v28 }
 0x155   :  { %1627 = vmatprep.subr.bf16.mxu0 %v1906_v0 }
 0x158   :  { %1629 = vmatpush3.bf16.msra.mxu0 %v2019_v34 }
 0x159   :  { %1630 = vmatprep.subr.bf16.mxu0 %v1906_v0 }
 0x15c   :  { %1632 = vmatpush3.bf16.msra.mxu0 %v2023_v38 }
 0x15d   :  { %1657 = vmatprep.subr.bf16.mxu0 %v1906_v0 }
 0x195   :  { %v260_v60 = vpop.permute.xlu0 %259 }
 0x196   :  { %v261_v63 = vmul.f32 %v2072_v43, %v260_v60 }
 0x212   :  { %v329_v62 = vpop.f32.mrb[2].mxu0 }
 0x213   :  { %v330_v2 = vadd.f32 %v329_v62, %v262_v61  ;;  %v1253_v3 = vpop.f32.mrb[3].mxu0 }
 0x215   :  { %v333_v4 = vadd.f32 %v330_v2, %v261_v63 }
 0x217   :  { %v334_v6 = vadd.f32 %v333_v4, %v2080_v51 }
 0x219   :  { %340 = vrot.lane.b32.xlu1 %v334_v6, %s1909_s8  ;;  %v335_v8 = vsub.f32 0.0, %v334_v6  ;;  %v343_v14 = vmul.f32 %v2067_v41, %v334_v6 }
 0x21b   :  { %v336_v9 = vmul.f32 1.442695, %v335_v8 }
 0x21d   :  { %1798 = vpow2.f32 %v336_v9 }
 0x227   :  { %v1799_v10 = vpop.eup %1798 }
 0x228   :  { %v338_v11 = vadd.f32 1.0, %v1799_v10 }
 0x22a   :  { %1800 = vrcp.f32 %v338_v11 }
 0x234   :  { %v1801_v12 = vpop.eup %1800 }
 0x235   :  { %1287 = vmatmul.mubr.f32.vlgmr.msra.gmra.mrb[2].mxu1 %v1801_v12 }
 0x236   :  { %1635 = vmatpush3.bf16.msra.mxu1 %v1981_v5  ;;  %1356 = vmatprep.mubr.msk.f32.mxu1 %vm1907_vm0, %v1908_v1 }
 0x237   :  { %1636 = vmatprep.subr.bf16.mxu1 %v1906_v0 }
 0x23a   :  { %1638 = vmatpush3.bf16.msra.mxu1 %v1984_v7 }
 0x23b   :  { %1639 = vmatprep.subr.bf16.mxu1 %v1906_v0 }
 0x23e   :  { %1641 = vmatpush3.bf16.msra.mxu1 %v1999_v15 }
 0x23f   :  { %1642 = vmatprep.subr.bf16.mxu1 %v1906_v0 }
 0x242   :  { %1644 = vmatpush3.bf16.msra.mxu1 %v2007_v22 }
 0x243   :  { %1645 = vmatprep.subr.bf16.mxu1 %v1906_v0 }
 0x246   :  { %1647 = vmatpush3.bf16.msra.mxu1 %v2011_v25 }
 0x247   :  { %1648 = vmatprep.subr.bf16.mxu1 %v1906_v0 }
 0x24a   :  { %1650 = vmatpush3.bf16.msra.mxu1 %v2015_v28 }
 0x24b   :  { %1651 = vmatprep.subr.bf16.mxu1 %v1906_v0 }
 0x24e   :  { %1653 = vmatpush3.bf16.msra.mxu1 %v2019_v34 }
 0x24f   :  { %1654 = vmatprep.subr.bf16.mxu1 %v1906_v0 }
 0x252   :  { %1656 = vmatpush3.bf16.msra.mxu1 %v2023_v38 }
 0x253   :  { %1681 = vmatprep.subr.bf16.mxu1 %v1906_v0 }
 0x28b   :  { %v341_v13 = vpop.permute.xlu1 %340 }
 0x28c   :  { %v342_v17 = vmul.f32 %v2072_v43, %v341_v13 }
 0x308   :  { %v410_v16 = vpop.f32.mrb[2].mxu1 }
 0x309   :  { %v411_v18 = vadd.f32 %v410_v16, %v343_v14  ;;  %v1288_v19 = vpop.f32.mrb[3].mxu1 }
 0x30b   :  { %v414_v20 = vadd.f32 %v411_v18, %v342_v17 }
 0x30d   :  { %v415_v21 = vadd.f32 %v414_v20, %v2080_v51 }
 0x30f   :  { %421 = vrot.lane.b32.xlu1 %v415_v21, %s1909_s8  ;;  %v416_v23 = vsub.f32 0.0, %v415_v21  ;;  %v424_v31 = vmul.f32 %v2067_v41, %v415_v21 }
 0x311   :  { %v417_v24 = vmul.f32 1.442695, %v416_v23 }
 0x313   :  { %1802 = vpow2.f32 %v417_v24 }
 0x31d   :  { %v1803_v26 = vpop.eup %1802 }
 0x31e   :  { %v419_v27 = vadd.f32 1.0, %v1803_v26 }
 0x320   :  { %1804 = vrcp.f32 %v419_v27 }
 0x32a   :  { %v1805_v29 = vpop.eup %1804 }
 0x32b   :  { %1322 = vmatmul.mubr.f32.vlgmr.msra.gmra.mrb[4].mxu0 %v1805_v29 }
 0x32c   :  { %1659 = vmatpush3.bf16.msra.mxu0 %v1981_v5  ;;  %1391 = vmatprep.mubr.msk.f32.mxu0 %vm1907_vm0, %v1908_v1 }
 0x32d   :  { %1660 = vmatprep.subr.bf16.mxu0 %v1906_v0 }
 0x330   :  { %1662 = vmatpush3.bf16.msra.mxu0 %v1984_v7 }
 0x331   :  { %1663 = vmatprep.subr.bf16.mxu0 %v1906_v0 }
 0x334   :  { %1665 = vmatpush3.bf16.msra.mxu0 %v1999_v15 }
 0x335   :  { %1666 = vmatprep.subr.bf16.mxu0 %v1906_v0 }
 0x338   :  { %1668 = vmatpush3.bf16.msra.mxu0 %v2007_v22 }
 0x339   :  { %1669 = vmatprep.subr.bf16.mxu0 %v1906_v0 }
 0x33c   :  { %1671 = vmatpush3.bf16.msra.mxu0 %v2011_v25 }
 0x33d   :  { %1672 = vmatprep.subr.bf16.mxu0 %v1906_v0 }
 0x340   :  { %1674 = vmatpush3.bf16.msra.mxu0 %v2015_v28 }
 0x341   :  { %1675 = vmatprep.subr.bf16.mxu0 %v1906_v0 }
 0x344   :  { %1677 = vmatpush3.bf16.msra.mxu0 %v2019_v34 }
 0x345   :  { %1678 = vmatprep.subr.bf16.mxu0 %v1906_v0 }
 0x348   :  { %1680 = vmatpush3.bf16.msra.mxu0 %v2023_v38 }
 0x349   :  { %1705 = vmatprep.subr.bf16.mxu0 %v1906_v0 }
 0x381   :  { %v422_v30 = vpop.permute.xlu1 %421 }
 0x382   :  { %v423_v33 = vmul.f32 %v2072_v43, %v422_v30 }
 0x3fe   :  { %v491_v32 = vpop.f32.mrb[4].mxu0 }
 0x3ff   :  { %v492_v35 = vadd.f32 %v491_v32, %v424_v31  ;;  %v1323_v36 = vpop.f32.mrb[5].mxu0 }
 0x401   :  { %v495_v37 = vadd.f32 %v492_v35, %v423_v33 }
 0x403   :  { %v496_v39 = vadd.f32 %v495_v37, %v2080_v51 }
 0x405   :  { %502 = vrot.lane.b32.xlu0 %v496_v39, %s1909_s8  ;;  %v497_v40 = vsub.f32 0.0, %v496_v39  ;;  %v505_v48 = vmul.f32 %v2067_v41, %v496_v39 }
 0x407   :  { %v498_v42 = vmul.f32 1.442695, %v497_v40 }
 0x409   :  { %1806 = vpow2.f32 %v498_v42 }
 0x413   :  { %v1807_v44 = vpop.eup %1806 }
 0x414   :  { %v500_v45 = vadd.f32 1.0, %v1807_v44 }
 0x416   :  { %1808 = vrcp.f32 %v500_v45 }
 0x420   :  { %v1809_v46 = vpop.eup %1808 }
 0x421   :  { %1357 = vmatmul.mubr.f32.vlgmr.msra.gmra.mrb[4].mxu1 %v1809_v46 }
 0x422   :  { %1683 = vmatpush3.bf16.msra.mxu1 %v1981_v5  ;;  %1426 = vmatprep.mubr.msk.f32.mxu1 %vm1907_vm0, %v1908_v1 }
 0x423   :  { %1684 = vmatprep.subr.bf16.mxu1 %v1906_v0 }
 0x426   :  { %1686 = vmatpush3.bf16.msra.mxu1 %v1984_v7 }
 0x427   :  { %1687 = vmatprep.subr.bf16.mxu1 %v1906_v0 }
 0x42a   :  { %1689 = vmatpush3.bf16.msra.mxu1 %v1999_v15 }
 0x42b   :  { %1690 = vmatprep.subr.bf16.mxu1 %v1906_v0 }
 0x42e   :  { %1692 = vmatpush3.bf16.msra.mxu1 %v2007_v22 }
 0x42f   :  { %1693 = vmatprep.subr.bf16.mxu1 %v1906_v0 }
 0x432   :  { %1695 = vmatpush3.bf16.msra.mxu1 %v2011_v25 }
 0x433   :  { %1696 = vmatprep.subr.bf16.mxu1 %v1906_v0 }
 0x436   :  { %1698 = vmatpush3.bf16.msra.mxu1 %v2015_v28 }
 0x437   :  { %1699 = vmatprep.subr.bf16.mxu1 %v1906_v0 }
 0x43a   :  { %1701 = vmatpush3.bf16.msra.mxu1 %v2019_v34 }
 0x43b   :  { %1702 = vmatprep.subr.bf16.mxu1 %v1906_v0 }
 0x43e   :  { %1704 = vmatpush3.bf16.msra.mxu1 %v2023_v38 }
 0x43f   :  { %1729 = vmatprep.subr.bf16.mxu1 %v1906_v0 }
 0x477   :  { %v503_v47 = vpop.permute.xlu0 %502 }
 0x478   :  { %v504_v50 = vmul.f32 %v2072_v43, %v503_v47 }
 0x4f4   :  { %v572_v49 = vpop.f32.mrb[4].mxu1 }
 0x4f5   :  { %v573_v52 = vadd.f32 %v572_v49, %v505_v48  ;;  %v1358_v53 = vpop.f32.mrb[5].mxu1 }
 0x4f7   :  { %v576_v54 = vadd.f32 %v573_v52, %v504_v50 }
 0x4f9   :  { %v577_v55 = vadd.f32 %v576_v54, %v2080_v51 }
 0x4fb   :  { %583 = vrot.lane.b32.xlu1 %v577_v55, %s1909_s8  ;;  %v578_v56 = vsub.f32 0.0, %v577_v55  ;;  %v586_v62 = vmul.f32 %v2067_v41, %v577_v55 }
 0x4fd   :  { %v579_v57 = vmul.f32 1.442695, %v578_v56 }
 0x4ff   :  { %1810 = vpow2.f32 %v579_v57 }
 0x509   :  { %v1811_v58 = vpop.eup %1810 }
 0x50a   :  { %v581_v59 = vadd.f32 1.0, %v1811_v58 }
 0x50c   :  { %1812 = vrcp.f32 %v581_v59 }
 0x516   :  { %v1813_v60 = vpop.eup %1812 }
 0x517   :  { %1392 = vmatmul.mubr.f32.vlgmr.msra.gmra.mrb[6].mxu0 %v1813_v60 }
 0x518   :  { %1707 = vmatpush3.bf16.msra.mxu0 %v1981_v5  ;;  %1461 = vmatprep.mubr.msk.f32.mxu0 %vm1907_vm0, %v1908_v1 }
 0x519   :  { %1708 = vmatprep.subr.bf16.mxu0 %v1906_v0 }
 0x51c   :  { %1710 = vmatpush3.bf16.msra.mxu0 %v1984_v7 }
 0x51d   :  { %1711 = vmatprep.subr.bf16.mxu0 %v1906_v0 }
 0x520   :  { %1713 = vmatpush3.bf16.msra.mxu0 %v1999_v15 }
 0x521   :  { %1714 = vmatprep.subr.bf16.mxu0 %v1906_v0 }
 0x524   :  { %1716 = vmatpush3.bf16.msra.mxu0 %v2007_v22 }
 0x525   :  { %1717 = vmatprep.subr.bf16.mxu0 %v1906_v0 }
 0x528   :  { %1719 = vmatpush3.bf16.msra.mxu0 %v2011_v25 }
 0x529   :  { %1720 = vmatprep.subr.bf16.mxu0 %v1906_v0 }
 0x52c   :  { %1722 = vmatpush3.bf16.msra.mxu0 %v2015_v28 }
 0x52d   :  { %1723 = vmatprep.subr.bf16.mxu0 %v1906_v0 }
 0x530   :  { %1725 = vmatpush3.bf16.msra.mxu0 %v2019_v34 }
 0x531   :  { %1726 = vmatprep.subr.bf16.mxu0 %v1906_v0 }
 0x534   :  { %1728 = vmatpush3.bf16.msra.mxu0 %v2023_v38 }
 0x535   :  { %1753 = vmatprep.subr.bf16.mxu0 %v1906_v0 }
 0x56d   :  { %v584_v61 = vpop.permute.xlu1 %583 }
 0x56e   :  { %v585_v2 = vmul.f32 %v2072_v43, %v584_v61 }
 0x5ea   :  { %v653_v63 = vpop.f32.mrb[6].mxu0 }
 0x5eb   :  { %v654_v3 = vadd.f32 %v653_v63, %v586_v62  ;;  %v1393_v4 = vpop.f32.mrb[7].mxu0 }
 0x5ed   :  { %v657_v6 = vadd.f32 %v654_v3, %v585_v2 }
 0x5ef   :  { %v658_v8 = vadd.f32 %v657_v6, %v2080_v51 }
 0x5f1   :  { %664 = vrot.lane.b32.xlu0 %v658_v8, %s1909_s8  ;;  %v659_v9 = vsub.f32 0.0, %v658_v8  ;;  %v667_v16 = vmul.f32 %v2067_v41, %v658_v8 }
 0x5f3   :  { %v660_v10 = vmul.f32 1.442695, %v659_v9 }
 0x5f5   :  { %1814 = vpow2.f32 %v660_v10 }
 0x5ff   :  { %v1815_v11 = vpop.eup %1814 }
 0x600   :  { %v662_v12 = vadd.f32 1.0, %v1815_v11 }
 0x602   :  { %1816 = vrcp.f32 %v662_v12 }
 0x60c   :  { %v1817_v13 = vpop.eup %1816 }
 0x60d   :  { %1427 = vmatmul.mubr.f32.vlgmr.msra.gmra.mrb[6].mxu1 %v1817_v13 }
 0x60e   :  { %1731 = vmatpush3.bf16.msra.mxu1 %v1981_v5  ;;  %1496 = vmatprep.mubr.msk.f32.mxu1 %vm1907_vm0, %v1908_v1 }
 0x60f   :  { %1732 = vmatprep.subr.bf16.mxu1 %v1906_v0 }
 0x612   :  { %1734 = vmatpush3.bf16.msra.mxu1 %v1984_v7 }
 0x613   :  { %1735 = vmatprep.subr.bf16.mxu1 %v1906_v0 }
 0x616   :  { %1737 = vmatpush3.bf16.msra.mxu1 %v1999_v15 }
 0x617   :  { %1738 = vmatprep.subr.bf16.mxu1 %v1906_v0 }
 0x61a   :  { %1740 = vmatpush3.bf16.msra.mxu1 %v2007_v22 }
 0x61b   :  { %1741 = vmatprep.subr.bf16.mxu1 %v1906_v0 }
 0x61e   :  { %1743 = vmatpush3.bf16.msra.mxu1 %v2011_v25 }
 0x61f   :  { %1744 = vmatprep.subr.bf16.mxu1 %v1906_v0 }
 0x622   :  { %1746 = vmatpush3.bf16.msra.mxu1 %v2015_v28 }
 0x623   :  { %1747 = vmatprep.subr.bf16.mxu1 %v1906_v0 }
 0x626   :  { %1749 = vmatpush3.bf16.msra.mxu1 %v2019_v34 }
 0x627   :  { %1750 = vmatprep.subr.bf16.mxu1 %v1906_v0 }
 0x62a   :  { %1752 = vmatpush3.bf16.msra.mxu1 %v2023_v38 }
 0x663   :  { %v665_v14 = vpop.permute.xlu0 %664 }
 0x664   :  { %v666_v18 = vmul.f32 %v2072_v43, %v665_v14 }
 0x6e0   :  { %v734_v17 = vpop.f32.mrb[6].mxu1 }
 0x6e1   :  { %v735_v19 = vadd.f32 %v734_v17, %v667_v16  ;;  %v1428_v20 = vpop.f32.mrb[7].mxu1 }
 0x6e3   :  { %v738_v21 = vadd.f32 %v735_v19, %v666_v18 }
 0x6e5   :  { %v739_v23 = vadd.f32 %v738_v21, %v2080_v51 }
 0x6e7   :  { %745 = vrot.lane.b32.xlu1 %v739_v23, %s1909_s8  ;;  %v740_v24 = vsub.f32 0.0, %v739_v23 }
 0x6e9   :  { %v741_v26 = vmul.f32 1.442695, %v740_v24 }
 0x6eb   :  { %1818 = vpow2.f32 %v741_v26 }
 0x6f5   :  { %v1819_v27 = vpop.eup %1818 }
 0x6f6   :  { %v743_v29 = vadd.f32 1.0, %v1819_v27 }
 0x6f8   :  { %1820 = vrcp.f32 %v743_v29 }
 0x702   :  { %v1821_v30 = vpop.eup %1820 }
 0x703   :  { %1462 = vmatmul.mubr.f32.vlgmr.msra.gmra.mrb[8].mxu0 %v1821_v30 }
 0x704   :  { %1755 = vmatpush3.bf16.msra.mxu0 %v1981_v5  ;;  %1531 = vmatprep.mubr.msk.f32.mxu0 %vm1907_vm0, %v1908_v1  ;;  %v748_v5 = vmul.f32 %v2067_v41, %v739_v23 }
 0x705   :  { %1756 = vmatprep.subr.bf16.mxu0 %v1906_v0 }
 0x708   :  { %1758 = vmatpush3.bf16.msra.mxu0 %v1984_v7 }
 0x709   :  { %1759 = vmatprep.subr.bf16.mxu0 %v1906_v0 }
 0x70c   :  { %1761 = vmatpush3.bf16.msra.mxu0 %v1999_v15 }
 0x70d   :  { %1762 = vmatprep.subr.bf16.mxu0 %v1906_v0 }
 0x710   :  { %1764 = vmatpush3.bf16.msra.mxu0 %v2007_v22 }
 0x711   :  { %1765 = vmatprep.subr.bf16.mxu0 %v1906_v0 }
 0x714   :  { %1767 = vmatpush3.bf16.msra.mxu0 %v2011_v25 }
 0x715   :  { %1768 = vmatprep.subr.bf16.mxu0 %v1906_v0 }
 0x718   :  { %1770 = vmatpush3.bf16.msra.mxu0 %v2015_v28 }
 0x719   :  { %1771 = vmatprep.subr.bf16.mxu0 %v1906_v0 }
 0x71c   :  { %1773 = vmatpush3.bf16.msra.mxu0 %v2019_v34 }
 0x71d   :  { %1774 = vmatprep.subr.bf16.mxu0 %v1906_v0 }
 0x720   :  { %1776 = vmatpush3.bf16.msra.mxu0 %v2023_v38 }
 0x759   :  { %v746_v1 = vpop.permute.xlu1 %745 }
 0x75a   :  { %v747_v15 = vmul.f32 %v2072_v43, %v746_v1 }
 0x7d6   :  { %v815_v7 = vpop.f32.mrb[8].mxu0 }
 0x7d7   :  { %v816_v22 = vadd.f32 %v815_v7, %v748_v5  ;;  %v1463_v25 = vpop.f32.mrb[9].mxu0 }
 0x7d9   :  { %v819_v31 = vadd.f32 %v816_v22, %v747_v15 }
 0x7db   :  { %v820_v32 = vadd.f32 %v819_v31, %v2080_v51 }
 0x7dd   :  { %826 = vrot.lane.b32.xlu0 %v820_v32, %s1909_s8  ;;  %v821_v28 = vsub.f32 0.0, %v820_v32  ;;  %v829_v36 = vmul.f32 %v2067_v41, %v820_v32 }
 0x7df   :  { %v822_v33 = vmul.f32 1.442695, %v821_v28 }
 0x7e1   :  { %1822 = vpow2.f32 %v822_v33 }
 0x7eb   :  { %v1823_v34 = vpop.eup %1822 }
 0x7ec   :  { %v824_v0 = vadd.f32 1.0, %v1823_v34 }
 0x7ee   :  { %1824 = vrcp.f32 %v824_v0 }
 0x7f8   :  { %v1825_v38 = vpop.eup %1824 }
 0x7f9   :  { %1497 = vmatmul.mubr.f32.vlgmr.msra.gmra.mrb[8].mxu1 %v1825_v38 }
 0x84f   :  { %v827_v35 = vpop.permute.xlu0 %826 }
 0x850   :  { %v828_v39 = vmul.f32 %v2072_v43, %v827_v35 }
 0x8cc   :  { %v896_v37 = vpop.f32.mrb[8].mxu1 }
 0x8cd   :  { %v897_v40 = vadd.f32 %v896_v37, %v829_v36  ;;  %v1498_v42 = vpop.f32.mrb[9].mxu1 }
 0x8cf   :  { %v900_v44 = vadd.f32 %v897_v40, %v828_v39 }
 0x8d1   :  { %v901_v45 = vadd.f32 %v900_v44, %v2080_v51 }
 0x8d3   :  { %907 = vrot.lane.b32.xlu1 %v901_v45, %s1909_s8  ;;  %v902_v46 = vsub.f32 0.0, %v901_v45  ;;  %v910_v53 = vmul.f32 %v2067_v41, %v901_v45 }
 0x8d5   :  { %v903_v47 = vmul.f32 1.442695, %v902_v46 }
 0x8d7   :  { %1826 = vpow2.f32 %v903_v47 }
 0x8e1   :  { %v1827_v48 = vpop.eup %1826 }
 0x8e2   :  { %v905_v49 = vadd.f32 1.0, %v1827_v48 }
 0x8e4   :  { %1828 = vrcp.f32 %v905_v49 }
 0x8ee   :  { %v1829_v50 = vpop.eup %1828 }
 0x8ef   :  { %1532 = vmatmul.mubr.f32.vlgmr.msra.gmra.mrb[10].mxu0 %v1829_v50 }
 0x945   :  { %v908_v52 = vpop.permute.xlu1 %907 }
 0x946   :  { %v909_v55 = vmul.f32 %v2072_v43, %v908_v52 }
 0x9c2   :  { %v977_v54 = vpop.f32.mrb[10].mxu0 }
 0x9c3   :  { %v978_v56 = vadd.f32 %v977_v54, %v910_v53  ;;  %v1533_v57 = vpop.f32.mrb[11].mxu0 }
 0x9c5   :  { %v981_v58 = vadd.f32 %v978_v56, %v909_v55 }
 0x9c7   :  { %v982_v59 = vadd.f32 %v981_v58, %v2080_v51 }
 0x9c9   :  { %983 = vst [vmem:[#allocation7] sm:$0xff] %v982_v59 }
 0x9ca   :  { %1885 = shalt.err (!%p1882_p6)
}
 0x9cb   :  { %s1886_s15 = scalar_lea.hbm %s2262_s7, 128 }
 0x9cc   :  { %p1887_p7 = scmp.ne.s32.totalorder %s2262_s7, %s1886_s15  ;;  %p1890_p8 = scmp.lt.u32.totalorder %s1886_s15, %s2262_s7 }
 0x9ce   :  { %p1892_p9 = pnand %p1890_p8, %p1887_p7 }
 0x9d0   :  { %1895 = shalt.err (!%p1892_p9)
}
 0x9d1   :  { %993 = dma.vmem_to_hbm [thread:$0]  %s991_s4, 128, %s2262_s7, [#allocation4]  }
 0x9d2   :  { %1900 = dma.done.wait [#allocation4], 128  }
 0x9d3   :  { %1901 = vsyncadd [#allocation4], 4294967168 }
 0x9d4   :  { %997 = vsyncpa [#allocation3], 1 }
 0x9d5   :  { %998 = vsyncpa [#allocation6], 1 }
 0x9d6   :  { %999 = vsyncpa [#allocation4], 1 }

</bundles_post_ra>
